<compile_context>
chip_gen: v6e
topology: v6e:2x2x1
jax: 0.10.0
libtpu: 0.0.40
codegen_flags: <defaults>
</compile_context>

<pallas_src>
import math

import jax
import jax.numpy as jnp
from jax.experimental import pallas as pl
from jax.experimental.pallas import tpu as pltpu


def filter_layer_kernel(x_ref, m2_ref, p_ref, gb_ref, o_ref):
    # x_ref block: (Bt, T*H) — batch tile, flattened (seq, hidden) on the lane axis.
    x = x_ref[...]                                                      # (Bt, TH) f32

    # Folded operator: rfft -> filter -> irfft, + residual, - per-(b,t) hidden mean.
    d = jnp.dot(x, m2_ref[...], preferred_element_type=jnp.float32)    # (Bt, TH)

    # Per-(b,t) biased variance via MXU pooling matmul (no cross-lane XLU reduces).
    s = jnp.dot(d * d, p_ref[...], preferred_element_type=jnp.float32)  # (Bt, TH)

    normed = d * jax.lax.rsqrt(s + 1e-12)

    gamma = gb_ref[0:1, :]                                              # (1, TH)
    beta = gb_ref[1:2, :]                                               # (1, TH)
    o_ref[...] = gamma * normed + beta


def _round_up(n: int, m: int) -> int:
    return ((n + m - 1) // m) * m


def make_filter_operator(complex_weight, T: int, H: int):
    """Fold ortho rfft -> complex filter -> ortho irfft into one (T*H, T*H) real matrix M
    such that y_flat = x_flat @ M with x_flat[b, t*H + h] = x[b, t, h]."""
    F = T // 2 + 1
    t = jnp.arange(T, dtype=jnp.float32)
    f = jnp.arange(F, dtype=jnp.float32)
    ang = 2.0 * math.pi * jnp.outer(f, t) / T                 # (F, T)
    inv_sqrt_t = 1.0 / math.sqrt(T)

    fc = jnp.cos(ang) * inv_sqrt_t                            # rfft real part   (F, T)
    fs = -jnp.sin(ang) * inv_sqrt_t                           # rfft imag part   (F, T)

    # irfft bin weights: 1 for DC and (even-T) Nyquist, 2 for the rest
    scale = jnp.full((F,), 2.0, dtype=jnp.float32)
    scale = scale.at[0].set(1.0)
    if T % 2 == 0:
        scale = scale.at[F - 1].set(1.0)
    gc = jnp.cos(ang.T) * scale[None, :] * inv_sqrt_t         # (T, F)
    gs = -jnp.sin(ang.T) * scale[None, :] * inv_sqrt_t        # (T, F)

    wr = complex_weight[0, :, :, 0].astype(jnp.float32)       # (F, H)
    wi = complex_weight[0, :, :, 1].astype(jnp.float32)       # (F, H)

    hp = jax.lax.Precision.HIGHEST
    # Per-hidden (T, T) operator A[h]:  y[:, h] = A[h] @ x[:, h]
    A = (jnp.einsum('tf,fh,fs->hts', gc, wr, fc, precision=hp)
         - jnp.einsum('tf,fh,fs->hts', gc, wi, fs, precision=hp)
         + jnp.einsum('tf,fh,fs->hts', gs, wi, fc, precision=hp)
         + jnp.einsum('tf,fh,fs->hts', gs, wr, fs, precision=hp))     # (H, T, T)

    # Block-diagonal embedding: M[s*H + h', t*H + h] = A[h, t, s] * delta(h, h')
    eye_h = jnp.eye(H, dtype=jnp.float32)
    M4 = jnp.einsum('hts,hk->skth', A, eye_h, precision=hp)           # (T, H, T, H)
    return M4.reshape(T * H, T * H)


def make_pool_matrix(T: int, H: int):
    """P[s*H + k, t*H + h] = delta(s, t) / H : per-(b,t) hidden mean, broadcast back."""
    eye_t = jnp.eye(T, dtype=jnp.float32)
    P4 = eye_t[:, None, :, None] * (jnp.ones((1, H, 1, H), jnp.float32) / H)
    return P4.reshape(T * H, T * H)


def filter_layer_forward(x, complex_weight, gamma, beta, *, block_b=1024):
    """x: (B, T, H) float32; complex_weight: (1, T//2+1, H, 2); gamma/beta: (H,)."""
    B, T, H = x.shape
    TH = T * H
    THp = _round_up(TH, 128)          # lane-dense last dim

    M = make_filter_operator(complex_weight, T, H)                      # (TH, TH)
    P = make_pool_matrix(T, H)                                          # (TH, TH)
    eye = jnp.eye(TH, dtype=jnp.float32)
    # Fold residual add and mean subtraction:  d = (x@M + x) - mean = x @ (M+I) @ (I-P)
    M2 = jnp.dot(M + eye, eye - P, precision=jax.lax.Precision.HIGHEST)  # (TH, TH)

    gb = jnp.stack([jnp.tile(gamma.astype(jnp.float32), T),
                    jnp.tile(beta.astype(jnp.float32), T)])             # (2, TH)

    x_flat = x.astype(jnp.float32).reshape(B, TH)
    if THp != TH:
        # Padded columns of M2 / P are zero, so padded lanes give d = 0, s = 0 and are
        # sliced away below; keep this invariant if the operator construction changes.
        pad = THp - TH
        M2 = jnp.pad(M2, ((0, pad), (0, pad)))
        P = jnp.pad(P, ((0, pad), (0, pad)))
        gb = jnp.pad(gb, ((0, 0), (0, pad)))
        x_flat = jnp.pad(x_flat, ((0, 0), (0, pad)))

    # Batch tiling: at least 2 grid steps (keeps both v7x TensorCores busy and gives the
    # DMA pipeline overlap), balanced tiles (avoids ~2x padding waste for unlucky B),
    # sublane-aligned (multiple of 8 rows).
    min_steps = 2
    n_steps = max(min_steps, pl.cdiv(B, block_b))
    Bt = _round_up(pl.cdiv(B, n_steps), 8)
    n_steps = max(min_steps, pl.cdiv(B, Bt))
    Bp = n_steps * Bt
    if Bp != B:
        x_flat = jnp.pad(x_flat, ((0, Bp - B), (0, 0)))

    const = lambda i: (0, 0)
    out = pl.pallas_call(
        filter_layer_kernel,
        out_shape=jax.ShapeDtypeStruct((Bp, THp), jnp.float32),
        grid=(n_steps,),
        in_specs=[
            pl.BlockSpec((Bt, THp), lambda i: (i, 0)),   # x batch tile
            pl.BlockSpec((THp, THp), const),             # folded operator M2 = (M+I)(I-P)
            pl.BlockSpec((THp, THp), const),             # layernorm variance pooling P
            pl.BlockSpec((2, THp), const),               # [gamma; beta] tiled over seq
        ],
        out_specs=pl.BlockSpec((Bt, THp), lambda i: (i, 0)),
        compiler_params=pltpu.CompilerParams(
            dimension_semantics=("parallel",)),          # batch tiles shard across TCs (v7x)
    )(x_flat, M2, P, gb)

    return out[:B, :TH].reshape(B, T, H)


def reference_forward(x, complex_weight, gamma, beta):
    """Pure-JAX reference matching the PyTorch FilterLayer (eval mode)."""
    B, T, H = x.shape
    xf = jnp.fft.rfft(x, axis=1, norm="ortho")
    w = complex_weight[..., 0] + 1j * complex_weight[..., 1]   # (1, F, H)
    xf = xf * w
    y = jnp.fft.irfft(xf, n=T, axis=1, norm="ortho")
    h = y + x
    u = jnp.mean(h, axis=-1, keepdims=True)
    s = jnp.mean((h - u) ** 2, axis=-1, keepdims=True)
    hn = (h - u) / jnp.sqrt(s + 1e-12)
    return gamma * hn + beta


if __name__ == "__main__":
    # config: max_seq_len=8, hidden_size=32, hidden_dropout_prob unused (eval mode)
    batch, seq_len, hidden = 2, 8, 32
    n_freq = seq_len // 2 + 1

    key = jax.random.PRNGKey(0)
    k_x, k_w = jax.random.split(key)
    x = jax.random.normal(k_x, (batch, seq_len, hidden), dtype=jnp.float32)
    # nn.Parameter(torch.randn(1, F, H, 2) * 0.02)
    complex_weight = jax.random.normal(k_w, (1, n_freq, hidden, 2), dtype=jnp.float32) * 0.02
    gamma = jnp.ones((hidden,), dtype=jnp.float32)   # LayerNorm.weight
    beta = jnp.zeros((hidden,), dtype=jnp.float32)   # LayerNorm.bias

    out = filter_layer_forward(x, complex_weight, gamma, beta)
    out = jax.block_until_ready(out)

    ref = reference_forward(x, complex_weight, gamma, beta)
    assert out.shape == (batch, seq_len, hidden)
    assert jnp.allclose(out, ref, atol=2e-3, rtol=2e-3), "mismatch vs reference"

    print("KERNEL_OK")
</pallas_src>

<mosaic_0001>
module attributes {stable_mosaic.version = 11 : i64} {
  func.func @filter_layer_kernel(%arg0: i32, %arg1: memref<8x256xf32, #tpu.memory_space<vmem>>, %arg2: memref<256x256xf32, #tpu.memory_space<vmem>>, %arg3: memref<256x256xf32, #tpu.memory_space<vmem>>, %arg4: memref<2x256xf32, #tpu.memory_space<vmem>>, %arg5: memref<8x256xf32, #tpu.memory_space<vmem>>) attributes {dimension_semantics = [#tpu.dimension_semantics<parallel>], iteration_bounds = array<i64: 2>, scalar_prefetch = 0 : i64, scratch_operands = 0 : i64, tpu.core_type = #tpu.core_type<tc>, window_params = [{transform_indices = @transform_0, window_bounds = array<i64: 8, 256>}, {pipeline_mode = #tpu.pipeline_mode<synchronous>, transform_indices = @transform_1, window_bounds = array<i64: 256, 256>}, {pipeline_mode = #tpu.pipeline_mode<synchronous>, transform_indices = @transform_2, window_bounds = array<i64: 256, 256>}, {pipeline_mode = #tpu.pipeline_mode<synchronous>, transform_indices = @transform_3, window_bounds = array<i64: 2, 256>}, {transform_indices = @transform_4, window_bounds = array<i64: 8, 256>}]} {
    %c0 = arith.constant 0 : index
    %c0_0 = arith.constant 0 : index
    %0 = vector.load %arg1[%c0, %c0_0] : memref<8x256xf32, #tpu.memory_space<vmem>>, vector<8x256xf32>
    %c0_1 = arith.constant 0 : index
    %c0_2 = arith.constant 0 : index
    %1 = vector.load %arg2[%c0_1, %c0_2] : memref<256x256xf32, #tpu.memory_space<vmem>>, vector<256x256xf32>
    %cst = arith.constant dense<0.000000e+00> : vector<8x256xf32>
    %2 = tpu.matmul %0, %1, %cst {dimension_numbers = #tpu.dot_dimension_numbers<[1], [0], [0], [1], [0, 0, 1, 1], [], []>} : vector<8x256xf32>, vector<256x256xf32>, vector<8x256xf32> -> vector<8x256xf32>
    %3 = arith.mulf %2, %2 : vector<8x256xf32>
    %c0_3 = arith.constant 0 : index
    %c0_4 = arith.constant 0 : index
    %4 = vector.load %arg3[%c0_3, %c0_4] : memref<256x256xf32, #tpu.memory_space<vmem>>, vector<256x256xf32>
    %cst_5 = arith.constant dense<0.000000e+00> : vector<8x256xf32>
    %5 = tpu.matmul %3, %4, %cst_5 {dimension_numbers = #tpu.dot_dimension_numbers<[1], [0], [0], [1], [0, 0, 1, 1], [], []>} : vector<8x256xf32>, vector<256x256xf32>, vector<8x256xf32> -> vector<8x256xf32>
    %cst_6 = arith.constant 9.99999996E-13 : f32
    %6 = vector.broadcast %cst_6 : f32 to vector<8x256xf32>
    %7 = arith.addf %5, %6 : vector<8x256xf32>
    %8 = math.rsqrt %7 : vector<8x256xf32>
    %9 = arith.mulf %2, %8 : vector<8x256xf32>
    %c0_7 = arith.constant 0 : index
    %c0_8 = arith.constant 0 : index
    %10 = vector.load %arg4[%c0_7, %c0_8] : memref<2x256xf32, #tpu.memory_space<vmem>>, vector<1x256xf32>
    %c1 = arith.constant 1 : index
    %c0_9 = arith.constant 0 : index
    %11 = vector.load %arg4[%c1, %c0_9] : memref<2x256xf32, #tpu.memory_space<vmem>>, vector<1x256xf32>
    %12 = vector.broadcast %10 : vector<1x256xf32> to vector<8x256xf32>
    %13 = arith.mulf %12, %9 : vector<8x256xf32>
    %14 = vector.broadcast %11 : vector<1x256xf32> to vector<8x256xf32>
    %15 = arith.addf %13, %14 : vector<8x256xf32>
    %c0_10 = arith.constant 0 : index
    %c0_11 = arith.constant 0 : index
    %16 = vector.load %arg5[%c0_10, %c0_11] : memref<8x256xf32, #tpu.memory_space<vmem>>, vector<8x256xf32>
    tpu.vector_store %arg5[%c0_10, %c0_11], %15 {strides = array<i32>} : memref<8x256xf32, #tpu.memory_space<vmem>>, vector<8x256xf32>,
    return
  }
  func.func @transform_0(%arg0: i32) -> (i32, i32) {
    %c0_i32 = arith.constant 0 : i32
    %c0_i32_0 = arith.constant 0 : i32
    return %arg0, %c0_i32 : i32, i32
  }
  func.func @transform_1(%arg0: i32) -> (i32, i32) {
    %c0_i32 = arith.constant 0 : i32
    %c0_i32_0 = arith.constant 0 : i32
    %c0_i32_1 = arith.constant 0 : i32
    return %c0_i32, %c0_i32_0 : i32, i32
  }
  func.func @transform_2(%arg0: i32) -> (i32, i32) {
    %c0_i32 = arith.constant 0 : i32
    %c0_i32_0 = arith.constant 0 : i32
    %c0_i32_1 = arith.constant 0 : i32
    return %c0_i32, %c0_i32_0 : i32, i32
  }
  func.func @transform_3(%arg0: i32) -> (i32, i32) {
    %c0_i32 = arith.constant 0 : i32
    %c0_i32_0 = arith.constant 0 : i32
    %c0_i32_1 = arith.constant 0 : i32
    return %c0_i32, %c0_i32_0 : i32, i32
  }
  func.func @transform_4(%arg0: i32) -> (i32, i32) {
    %c0_i32 = arith.constant 0 : i32
    %c0_i32_0 = arith.constant 0 : i32
    return %arg0, %c0_i32 : i32, i32
  }
}

</mosaic_0001>

<bundles_post_ra>
// kernel: tpu_custom_call.1
= control target key start
LH: loop header
LB: loop body
LE: loop exit
PB: predicated region body
PF: predicated region fallthrough
CT: control target
= control target key end

     0   :  { %9 = vsyncpa [#allocation3], 0  ;;  %s1110_s0 = inlined_call_operand.hbm [shape: f32[16,256], index: 0, kind: input, shape index: {}]   ;;  %s1111_s1 = inlined_call_operand.hbm [shape: f32[256,256], index: 1, kind: input, shape index: {}]   ;;  %s1112_s2 = inlined_call_operand.hbm [shape: f32[256,256], index: 2, kind: input, shape index: {}]   ;;  %s1113_s3 = inlined_call_operand.vmem [shape: f32[2,256], index: 3, kind: input, shape index: {}]   ;;  %s1114_s4 = inlined_call_operand.hbm [shape: f32[16,256], index: 4, kind: output, shape index: {}]  }
   0x1   :  { %11 = vsyncpa [#allocation3 + $0x1], 0 }
   0x2   :  { %12 = vsyncpa [#allocation6], 0 }
   0x3   :  { %13 = vsyncpa [#allocation4], 0 }
   0x4   :  { %15 = vsyncpa [#allocation4 + $0x1], 0  ;;  %s931_s15 = smov 0   ;;  %s933_s16 = smov 0  }
   0x5   :  { %s935_s17 = smov 0   ;;  %s937_s18 = smov 0  }
   0x6 LB: > { %s952_s19 = sadd.s32 4294967295, %s898_s18   ;;  %s656_s20 = sadd.s32 4294967294, %s898_s18   ;;  %s898_s18 = sphi %s937_s18, %s1136_s18   ;;  %s894_s17 = sphi %s935_s17, %s1135_s17   ;;  %s890_s16 = sphi %s933_s16, %s1134_s16   ;;  %s886_s15 = sphi %s931_s15, %s1133_s15  }
   0x7   : > { %p41_p0 = scmp.ne.s32.totalorder %s890_s16, %s886_s15  ;;  %p1115_p1 = scmp.eq.s32.totalorder %s952_s19, 0 }
   0x8   : > { %p134_p3 = scmp.eq.s32.totalorder %s656_s20, 1  ;;  %p657_p5 = scmp.ge.s32.totalorder %s898_s18, 1 }
   0x9   : > { %p961_p4 = por %p1115_p1, %p41_p0  ;;  %p141_p7 = scmp.lt.s32.totalorder %s898_s18, 3 }
   0xa   : > { %p966_p6 = por %p134_p3, %p41_p0  ;;  %s900_s24 = smov [#allocation5]  }
   0xb   : > { %s1119_s21 = scalar_select %p961_p4, 1, 0 }
   0xc   : > { %s1120_s22 = scalar_select %p966_p6, 1, 0 }
   0xd   : > { %p971_p8 = pnand %p657_p5, %p141_p7  ;;  %s153_s25 = sshll.u32 %s900_s24, 4  ;;  %s154_s25 = int_to_ptr.vmem [resolvable:$true] %s153_s25 }
   0xe   : > { %s901_s27 = smov [#allocation7]   ;;  %s761_s29 = scalar_lea.vmem %s154_s25, 8192 }
   0xf   : > { %s1121_s23 = scalar_select %p971_p8, 1, 0 }
  0x10   : > { %p689_p9 = pneg %p971_p8  ;;  %s166_s28 = sshll.u32 %s901_s27, 4  ;;  %s167_s28 = int_to_ptr.vmem [resolvable:$true] %s166_s28 }
  0x11   : > { %p762_p13 = scmp.ne.s32.totalorder %s154_s25, %s761_s29  ;;  %p769_p5 = scmp.lt.s32.totalorder %s154_s25, %s154_s25 }
  0x12   : > { %p980_p11 = pnand %p689_p9, %p1115_p1  ;;  %p770_p7 = scmp.lt.s32.totalorder %s761_s29, %s761_s29 }
  0x14   : > { %p752_p12 = pneg %p980_p11  ;;  %p771_p10 = por %p770_p7, %p769_p5 }
  0x16   : > { %p764_p0 = pnand %p762_p13, %p752_p12 }
  0x18   : > { %p765_p3 = pneg %p764_p0 }
  0x1a   : > { %p772_p9 = pnand %p771_p10, %p765_p3 }
  0x1c   : > { %775 = shalt.err (!%p772_p9)
}
  0x1d   : > { %s902_s30 = smov 256   ;;  %s903_s5 = smov 16  }
  0x1e   : > { %692 = dma.hbm_to_vmem [thread:$0]  (!%p980_p11), %s1111_s1, 8192, %s154_s25, [#allocation6], %s902_s30, %s902_s30, %s903_s5  }
  0x1f   : > { %s787_s8 = scalar_lea.vmem %s167_s28, 8192  ;;  %p795_p2 = scmp.lt.s32.totalorder %s167_s28, %s167_s28 }
  0x20   : > { %p788_p1 = scmp.ne.s32.totalorder %s167_s28, %s787_s8  ;;  %p796_p6 = scmp.lt.s32.totalorder %s787_s8, %s787_s8 }
  0x22   : > { %p790_p13 = pnand %p788_p1, %p752_p12  ;;  %p797_p5 = por %p796_p6, %p795_p2 }
  0x24   : > { %p791_p0 = pneg %p790_p13 }
  0x26   : > { %p798_p10 = pnand %p797_p5, %p791_p0 }
  0x28   : > { %801 = shalt.err (!%p798_p10)
}
  0x29   : > { %695 = dma.hbm_to_vmem [thread:$0]  (!%p980_p11), %s1112_s2, 8192, %s167_s28, [#allocation6], %s902_s30, %s902_s30, %s903_s5  }
  0x2a   : > { %s1003_s11 = sadd.s32 1, %s898_s18   ;;  %s28_s12 = sadd.s32 1, %s894_s17 }
  0x2b   : > { %s25_s13 = ssub.s32 %s898_s18, %s1003_s11  ;;  %p35_p1 = scmp.ne.s32.totalorder %s894_s17, %s890_s16 }
  0x2c   : > { %p26_p2 = scmp.eq.s32.totalorder %s25_s13, 0  ;;  %p36_p6 = scmp.eq.s32.totalorder %s898_s18, 0 }
  0x2d   : > { %p1123_p12 = scmp.eq.s32.totalorder %s952_s19, 1  ;;  %p706_p7 = scmp.lt.s32.totalorder %s898_s18, 2 }
  0x2e   : > { %s1019_s20 = scalar_select %p26_p2, %s894_s17, %s28_s12  }
  0x2f   : > { %p1013_p3 = por %p1123_p12, %p35_p1  ;;  %p37_p9 = por %p36_p6, %p35_p1 }
  0x30   : > { %s183_s24 = sand.u32 1, %s894_s17   ;;  %s675_s26 = sshll.u32 %s898_s18, 8 }
  0x31   : > { %s1124_s14 = scalar_select %p1013_p3, 1, 0 }
  0x32   : > { %s661_s25 = sshll.u32 %s183_s24, 4  ;;  %s1026_s29 = scalar_lea.hbm %s1110_s0, %s675_s26 }
  0x33   : > { %s187_s30 = scalar_lea.vmem [#allocation2], %s661_s25  ;;  %p1028_p11 = pnand %p706_p7, %p37_p9 }
  0x34   : > { %s195_s5 = sshll.u32 %s187_s30, 4  ;;  %s184_s7 = scalar_lea.sflag [#allocation3], %s183_s24  ;;  %s196_s5 = int_to_ptr.vmem [resolvable:$true] %s195_s5 }
  0x35   : > { %s802_s8 = scalar_lea.hbm %s1026_s29, 256  ;;  %p804_p0 = pneg %p1028_p11 }
  0x36   : > { %p803_p13 = scmp.ne.s32.totalorder %s1026_s29, %s802_s8  ;;  %s807_s12 = scalar_lea.hbm %s1110_s0, 512 }
  0x37   : > { %p808_p1 = scmp.lt.s32.totalorder %s1026_s29, %s1110_s0  ;;  %p809_p2 = scmp.lt.s32.totalorder %s807_s12, %s802_s8 }
  0x38   : > { %p805_p5 = pnand %p804_p0, %p803_p13 }
  0x39   : > { %p810_p6 = por %p809_p2, %p808_p1 }
  0x3a   : > { %p806_p10 = pneg %p805_p5 }
  0x3c   : > { %p811_p12 = pnand %p810_p6, %p806_p10 }
  0x3e   : > { %814 = shalt.err (!%p811_p12)
}
  0x3f   : > { %s815_s26 = scalar_lea.vmem %s196_s5, 256  ;;  %s904_s24 = smov [#allocation2]  }
  0x40   : > { %p816_p7 = scmp.ne.s32.totalorder %s196_s5, %s815_s26  ;;  %s820_s27 = sshll.u32 %s904_s24, 4  ;;  %s821_s27 = int_to_ptr.vmem [resolvable:$false] %s820_s27 }
  0x41   : > { %s822_s28 = scalar_lea.vmem %s821_s27, 512  ;;  %p823_p13 = scmp.lt.s32.totalorder %s196_s5, %s821_s27 }
  0x42   : > { %p818_p9 = pnand %p816_p7, %p804_p0  ;;  %p824_p5 = scmp.lt.s32.totalorder %s822_s28, %s815_s26 }
  0x44   : > { %p819_p3 = pneg %p818_p9  ;;  %p825_p4 = por %p824_p5, %p823_p13 }
  0x46   : > { %p826_p8 = pnand %p825_p4, %p819_p3 }
  0x48   : > { %829 = shalt.err (!%p826_p8)
}
  0x49   : > { %699 = dma.hbm_to_vmem [thread:$0]  (!%p1028_p11), %s1026_s29, 256, %s196_s5, %s184_s7  }
  0x4a   : > { %p1126_p10 = scmp.ne.s32.totalorder %s1121_s23, 0 }
  0x4b   : > { %s1049_s30 = sand.u32 (!%p1126_p10), 1, %s890_s16   ;;  %p1127_p4 = scmp.ne.s32.totalorder (!%p1126_p10), %s1119_s21, 0 }
  0x4c   : > { %204 = sbr.rel (%p1126_p10) target bundleno = 578 (0x242), region = 36  ;;  %s665_s8 = sshll.u32 (!%p1126_p10), %s1049_s30, 4 }
  0x4d   : > { %s207_s9 = scalar_lea.sflag (!%p1126_p10), [#allocation3], %s1049_s30  ;;  %s1055_s10 = scalar_lea.vmem (!%p1126_p10), [#allocation2], %s665_s8 }
  0x51   : > { %873 = dma.done.wait (%p1127_p4), %s207_s9, 256  }
  0x52   : > { %875 = vsyncadd (%p1127_p4), %s207_s9, 4294967040  ;;  %p1128_p8 = scmp.eq.s32.totalorder %s952_s19, 0 }
  0x54   : > { %877 = dma.done.wait (%p1128_p8), [#allocation6], 16384   ;;  %p1129_p3 = pmov %p1128_p8 }
  0x55   : > { %v276_v0 = vld [vmem:[#allocation5 + $0xf8] sm:$0xff]  ;;  %v275_v1 = vld [vmem:[#allocation5 + $0xf0] sm:$0xff]  ;;  %v274_v2 = vld [vmem:[#allocation5 + $0xe8] sm:$0xff]  ;;  %s676_s6 = sshll.u32 %s952_s19, 8  ;;  %s242_s7 = scalar_lea.vmem [#allocation8], %s665_s8 }
  0x56   : > { %879 = vsyncadd (%p1129_p3), [#allocation6], 4294950912  ;;  %309 = vmatprep.subr.mxu0 %v276_v0  ;;  %v273_v3 = vld [vmem:[#allocation5 + $0xe0] sm:$0xff]  ;;  %v272_v4 = vld [vmem:[#allocation5 + $0xd8] sm:$0xff]  ;;  %s567_s12 = sshll.u32 %s242_s7, 4  ;;  %s565_s26 = scalar_lea.hbm %s1114_s4, %s676_s6  ;;  %s568_s12 = int_to_ptr.vmem [resolvable:$true] %s567_s12 }
  0x57   : > { %310 = vmatpush1.msra.mxu0 %v275_v1  ;;  %v271_v5 = vld [vmem:[#allocation5 + $0xd0] sm:$0xff]  ;;  %v270_v6 = vld [vmem:[#allocation5 + $0xc8] sm:$0xff]  ;;  %v269_v7 = vld [vmem:[#allocation5 + $0xc0] sm:$0xff]  ;;  %s553_s24 = scalar_lea.sflag [#allocation4], %s1049_s30  ;;  %s830_s27 = scalar_lea.vmem %s568_s12, 256 }
  0x58   : > { %311 = vmatprep.subr.mxu0 %v274_v2  ;;  %v268_v8 = vld [vmem:[#allocation5 + $0xb8] sm:$0xff]  ;;  %v267_v9 = vld [vmem:[#allocation5 + $0xb0] sm:$0xff]  ;;  %v266_v10 = vld [vmem:[#allocation5 + $0xa8] sm:$0xff]  ;;  %p831_p11 = scmp.ne.s32.totalorder %s568_s12, %s830_s27  ;;  %p1130_p0 = scmp.ne.s32.totalorder %s1124_s14, 0 }
  0x59   : > { %312 = vmatpush1.msra.mxu0 %v273_v3  ;;  %v265_v11 = vld [vmem:[#allocation5 + $0xa0] sm:$0xff]  ;;  %v264_v12 = vld [vmem:[#allocation5 + $0x98] sm:$0xff]  ;;  %v263_v13 = vld [vmem:[#allocation5 + $0x90] sm:$0xff]  ;;  %s905_s19 = smov [#allocation8]  }
  0x5a   : > { %313 = vmatprep.subr.mxu0 %v272_v4  ;;  %v262_v14 = vld [vmem:[#allocation5 + $0x88] sm:$0xff]  ;;  %v261_v15 = vld [vmem:[#allocation5 + $0x80] sm:$0xff]  ;;  %v260_v16 = vld [vmem:[#allocation5 + $0x78] sm:$0xff]  ;;  %p832_p1 = pnand %p831_p11, %p1130_p0  ;;  %s834_s28 = sshll.u32 %s905_s19, 4  ;;  %s835_s28 = int_to_ptr.vmem [resolvable:$false] %s834_s28 }
  0x5b   : > { %314 = vmatpush1.msra.mxu0 %v271_v5  ;;  %v259_v17 = vld [vmem:[#allocation5 + $0x70] sm:$0xff]  ;;  %v258_v18 = vld [vmem:[#allocation5 + $0x68] sm:$0xff]  ;;  %v257_v19 = vld [vmem:[#allocation5 + $0x60] sm:$0xff]  ;;  %s836_s8 = scalar_lea.vmem %s835_s28, 512  ;;  %p837_p6 = scmp.lt.s32.totalorder %s568_s12, %s835_s28 }
  0x5c   : > { %315 = vmatprep.subr.mxu0 %v270_v6  ;;  %v256_v20 = vld [vmem:[#allocation5 + $0x58] sm:$0xff]  ;;  %v255_v21 = vld [vmem:[#allocation5 + $0x50] sm:$0xff]  ;;  %v254_v22 = vld [vmem:[#allocation5 + $0x48] sm:$0xff]  ;;  %p833_p2 = pneg %p832_p1  ;;  %p838_p12 = scmp.lt.s32.totalorder %s836_s8, %s830_s27 }
  0x5d   : > { %316 = vmatpush1.msra.mxu0 %v269_v7  ;;  %v253_v23 = vld [vmem:[#allocation5 + $0x40] sm:$0xff]  ;;  %v252_v24 = vld [vmem:[#allocation5 + $0x38] sm:$0xff]  ;;  %v412_v27 = vld [vmem:[#allocation7 + $0xf0] sm:$0xff] }
  0x5e   : > { %317 = vmatprep.subr.mxu0 %v268_v8  ;;  %v244_v25 = vld [vmem:[%s1055_s10 + $0x8] sm:$0xff]  ;;  %v251_v29 = vld [vmem:[#allocation5 + $0x30] sm:$0xff]  ;;  %v410_v30 = vld [vmem:[#allocation7 + $0xe0] sm:$0xff]  ;;  %p839_p7 = por %p838_p12, %p837_p6 }
  0x5f   : > { %318 = vmatpush1.msra.mxu0 %v267_v9  ;;  %373 = vmatprep.mubr.f32.mxu0 %v244_v25  ;;  %v413_v26 = vld [vmem:[#allocation7 + $0xf8] sm:$0xff]  ;;  %v411_v28 = vld [vmem:[#allocation7 + $0xe8] sm:$0xff]  ;;  %v249_v33 = vld [vmem:[#allocation5 + $0x20] sm:$0xff] }
  0x60   : > { %319 = vmatprep.subr.mxu0 %v266_v10  ;;  %446 = vmatprep.subr.mxu1 %v413_v26  ;;  %v250_v31 = vld [vmem:[#allocation5 + $0x28] sm:$0xff]  ;;  %v409_v32 = vld [vmem:[#allocation7 + $0xd8] sm:$0xff]  ;;  %v408_v34 = vld [vmem:[#allocation7 + $0xd0] sm:$0xff]  ;;  %p840_p9 = pnand %p839_p7, %p833_p2 }
  0x61   : > { %320 = vmatpush1.msra.mxu0 %v265_v11  ;;  %447 = vmatpush1.msra.mxu1 %v412_v27  ;;  %v248_v35 = vld [vmem:[#allocation5 + $0x18] sm:$0xff]  ;;  %v407_v36 = vld [vmem:[#allocation7 + $0xc8] sm:$0xff]  ;;  %v247_v37 = vld [vmem:[#allocation5 + $0x10] sm:$0xff] }
  0x62   : > { %321 = vmatprep.subr.mxu0 %v264_v12  ;;  %448 = vmatprep.subr.mxu1 %v411_v28  ;;  %v406_v38 = vld [vmem:[#allocation7 + $0xc0] sm:$0xff]  ;;  %v246_v39 = vld [vmem:[#allocation5 + $0x8] sm:$0xff]  ;;  %v405_v40 = vld [vmem:[#allocation7 + $0xb8] sm:$0xff] }
  0x63   : > { %322 = vmatpush1.msra.mxu0 %v263_v13  ;;  %449 = vmatpush1.msra.mxu1 %v410_v30  ;;  %v245_v41 = vld [vmem:[#allocation5] sm:$0xff]  ;;  %v404_v42 = vld [vmem:[#allocation7 + $0xb0] sm:$0xff]  ;;  %v308_v43 = vld [vmem:[#allocation5 + $0x1f8] sm:$0xff] }
  0x64   : > { %323 = vmatprep.subr.mxu0 %v262_v14  ;;  %450 = vmatprep.subr.mxu1 %v409_v32  ;;  %v403_v44 = vld [vmem:[#allocation7 + $0xa8] sm:$0xff]  ;;  %v307_v45 = vld [vmem:[#allocation5 + $0x1f0] sm:$0xff]  ;;  %v402_v46 = vld [vmem:[#allocation7 + $0xa0] sm:$0xff] }
  0x65   : > { %324 = vmatpush1.msra.mxu0 %v261_v15  ;;  %451 = vmatpush1.msra.mxu1 %v408_v34  ;;  %v306_v47 = vld [vmem:[#allocation5 + $0x1e8] sm:$0xff]  ;;  %v401_v48 = vld [vmem:[#allocation7 + $0x98] sm:$0xff]  ;;  %v305_v49 = vld [vmem:[#allocation5 + $0x1e0] sm:$0xff] }
  0x66   : > { %325 = vmatprep.subr.mxu0 %v260_v16  ;;  %452 = vmatprep.subr.mxu1 %v407_v36  ;;  %v400_v50 = vld [vmem:[#allocation7 + $0x90] sm:$0xff]  ;;  %v304_v51 = vld [vmem:[#allocation5 + $0x1d8] sm:$0xff]  ;;  %v399_v52 = vld [vmem:[#allocation7 + $0x88] sm:$0xff] }
  0x67   : > { %326 = vmatpush1.msra.mxu0 %v259_v17  ;;  %453 = vmatpush1.msra.mxu1 %v406_v38  ;;  %v303_v53 = vld [vmem:[#allocation5 + $0x1d0] sm:$0xff]  ;;  %v398_v54 = vld [vmem:[#allocation7 + $0x80] sm:$0xff]  ;;  %v302_v55 = vld [vmem:[#allocation5 + $0x1c8] sm:$0xff] }
  0x68   : > { %327 = vmatprep.subr.mxu0 %v258_v18  ;;  %454 = vmatprep.subr.mxu1 %v405_v40  ;;  %v397_v56 = vld [vmem:[#allocation7 + $0x78] sm:$0xff]  ;;  %v301_v57 = vld [vmem:[#allocation5 + $0x1c0] sm:$0xff]  ;;  %v396_v58 = vld [vmem:[#allocation7 + $0x70] sm:$0xff] }
  0x69   : > { %328 = vmatpush1.msra.mxu0 %v257_v19  ;;  %455 = vmatpush1.msra.mxu1 %v404_v42  ;;  %v300_v59 = vld [vmem:[#allocation5 + $0x1b8] sm:$0xff]  ;;  %v395_v60 = vld [vmem:[#allocation7 + $0x68] sm:$0xff]  ;;  %v299_v61 = vld [vmem:[#allocation5 + $0x1b0] sm:$0xff] }
  0x6a   : > { %329 = vmatprep.subr.mxu0 %v256_v20  ;;  %456 = vmatprep.subr.mxu1 %v403_v44  ;;  %v394_v62 = vld [vmem:[#allocation7 + $0x60] sm:$0xff]  ;;  %v298_v63 = vld [vmem:[#allocation5 + $0x1a8] sm:$0xff]  ;;  %v393_v0 = vld [vmem:[#allocation7 + $0x58] sm:$0xff] }
  0x6b   : > { %330 = vmatpush1.msra.mxu0 %v255_v21  ;;  %457 = vmatpush1.msra.mxu1 %v402_v46  ;;  %v297_v1 = vld [vmem:[#allocation5 + $0x1a0] sm:$0xff]  ;;  %v392_v2 = vld [vmem:[#allocation7 + $0x50] sm:$0xff]  ;;  %v296_v3 = vld [vmem:[#allocation5 + $0x198] sm:$0xff] }
  0x6c   : > { %331 = vmatprep.subr.mxu0 %v254_v22  ;;  %458 = vmatprep.subr.mxu1 %v401_v48  ;;  %v391_v4 = vld [vmem:[#allocation7 + $0x48] sm:$0xff]  ;;  %v295_v5 = vld [vmem:[#allocation5 + $0x190] sm:$0xff]  ;;  %v390_v6 = vld [vmem:[#allocation7 + $0x40] sm:$0xff] }
  0x6d   : > { %332 = vmatpush1.msra.mxu0 %v253_v23  ;;  %459 = vmatpush1.msra.mxu1 %v400_v50  ;;  %v294_v7 = vld [vmem:[#allocation5 + $0x188] sm:$0xff]  ;;  %v389_v8 = vld [vmem:[#allocation7 + $0x38] sm:$0xff]  ;;  %v293_v9 = vld [vmem:[#allocation5 + $0x180] sm:$0xff] }
  0x6e   : > { %333 = vmatprep.subr.mxu0 %v252_v24  ;;  %460 = vmatprep.subr.mxu1 %v399_v52  ;;  %v388_v10 = vld [vmem:[#allocation7 + $0x30] sm:$0xff]  ;;  %v292_v11 = vld [vmem:[#allocation5 + $0x178] sm:$0xff]  ;;  %v387_v12 = vld [vmem:[#allocation7 + $0x28] sm:$0xff] }
  0x6f   : > { %334 = vmatpush1.msra.mxu0 %v251_v29  ;;  %461 = vmatpush1.msra.mxu1 %v398_v54  ;;  %v291_v13 = vld [vmem:[#allocation5 + $0x170] sm:$0xff]  ;;  %v386_v14 = vld [vmem:[#allocation7 + $0x20] sm:$0xff]  ;;  %v290_v15 = vld [vmem:[#allocation5 + $0x168] sm:$0xff] }
  0x70   : > { %335 = vmatprep.subr.mxu0 %v250_v31  ;;  %462 = vmatprep.subr.mxu1 %v397_v56  ;;  %v385_v16 = vld [vmem:[#allocation7 + $0x18] sm:$0xff]  ;;  %v289_v17 = vld [vmem:[#allocation5 + $0x160] sm:$0xff]  ;;  %v384_v18 = vld [vmem:[#allocation7 + $0x10] sm:$0xff] }
  0x71   : > { %336 = vmatpush1.msra.mxu0 %v249_v33  ;;  %463 = vmatpush1.msra.mxu1 %v396_v58  ;;  %v288_v19 = vld [vmem:[#allocation5 + $0x158] sm:$0xff]  ;;  %v383_v20 = vld [vmem:[#allocation7 + $0x8] sm:$0xff]  ;;  %v287_v21 = vld [vmem:[#allocation5 + $0x150] sm:$0xff] }
  0x72   : > { %337 = vmatprep.subr.mxu0 %v248_v35  ;;  %464 = vmatprep.subr.mxu1 %v395_v60  ;;  %v382_v22 = vld [vmem:[#allocation7] sm:$0xff]  ;;  %v286_v23 = vld [vmem:[#allocation5 + $0x148] sm:$0xff]  ;;  %v445_v24 = vld [vmem:[#allocation7 + $0x1f8] sm:$0xff] }
  0x73   : > { %338 = vmatpush1.msra.mxu0 %v247_v37  ;;  %465 = vmatpush1.msra.mxu1 %v394_v62  ;;  %v285_v25 = vld [vmem:[#allocation5 + $0x140] sm:$0xff]  ;;  %v444_v26 = vld [vmem:[#allocation7 + $0x1f0] sm:$0xff]  ;;  %v284_v27 = vld [vmem:[#allocation5 + $0x138] sm:$0xff] }
  0x74   : > { %339 = vmatprep.subr.mxu0 %v246_v39  ;;  %466 = vmatprep.subr.mxu1 %v393_v0  ;;  %v443_v28 = vld [vmem:[#allocation7 + $0x1e8] sm:$0xff]  ;;  %v283_v29 = vld [vmem:[#allocation5 + $0x130] sm:$0xff]  ;;  %v442_v30 = vld [vmem:[#allocation7 + $0x1e0] sm:$0xff] }
  0x75   : > { %340 = vmatpush1.msra.mxu0 %v245_v41  ;;  %467 = vmatpush1.msra.mxu1 %v392_v2  ;;  %v282_v31 = vld [vmem:[#allocation5 + $0x128] sm:$0xff]  ;;  %v441_v32 = vld [vmem:[#allocation7 + $0x1d8] sm:$0xff]  ;;  %v281_v33 = vld [vmem:[#allocation5 + $0x120] sm:$0xff] }
  0x76   : > { %341 = vmatprep.subr.mxu0 %v308_v43  ;;  %468 = vmatprep.subr.mxu1 %v391_v4  ;;  %v440_v34 = vld [vmem:[#allocation7 + $0x1d0] sm:$0xff]  ;;  %v280_v35 = vld [vmem:[#allocation5 + $0x118] sm:$0xff]  ;;  %v439_v36 = vld [vmem:[#allocation7 + $0x1c8] sm:$0xff] }
  0x77   : > { %342 = vmatpush2.msra.mxu0 %v307_v45  ;;  %469 = vmatpush1.msra.mxu1 %v390_v6  ;;  %v279_v37 = vld [vmem:[#allocation5 + $0x110] sm:$0xff]  ;;  %v438_v38 = vld [vmem:[#allocation7 + $0x1c0] sm:$0xff]  ;;  %v278_v39 = vld [vmem:[#allocation5 + $0x108] sm:$0xff] }
  0x78   : > { %343 = vmatprep.subr.mxu0 %v306_v47  ;;  %470 = vmatprep.subr.mxu1 %v389_v8  ;;  %v437_v40 = vld [vmem:[#allocation7 + $0x1b8] sm:$0xff]  ;;  %v277_v41 = vld [vmem:[#allocation5 + $0x100] sm:$0xff]  ;;  %v436_v42 = vld [vmem:[#allocation7 + $0x1b0] sm:$0xff] }
  0x79   : > { %344 = vmatpush2.msra.mxu0 %v305_v49  ;;  %471 = vmatpush1.msra.mxu1 %v388_v10  ;;  %v243_v43 = vld [vmem:[%s1055_s10] sm:$0xff]  ;;  %v435_v44 = vld [vmem:[#allocation7 + $0x1a8] sm:$0xff]  ;;  %v433_v46 = vld [vmem:[#allocation7 + $0x198] sm:$0xff]  ;;  %v525_v10 = vlaneseq }
  0x7a   : > { %345 = vmatprep.subr.mxu0 %v304_v51  ;;  %472 = vmatprep.subr.mxu1 %v387_v12  ;;  %v434_v45 = vld [vmem:[#allocation7 + $0x1a0] sm:$0xff]  ;;  %v432_v47 = vld [vmem:[#allocation7 + $0x190] sm:$0xff]  ;;  %v431_v48 = vld [vmem:[#allocation7 + $0x188] sm:$0xff] }
  0x7b   : > { %346 = vmatpush2.msra.mxu0 %v303_v53  ;;  %473 = vmatpush1.msra.mxu1 %v386_v14  ;;  %v430_v49 = vld [vmem:[#allocation7 + $0x180] sm:$0xff]  ;;  %v429_v50 = vld [vmem:[#allocation7 + $0x178] sm:$0xff]  ;;  %v428_v51 = vld [vmem:[#allocation7 + $0x170] sm:$0xff] }
  0x7c   : > { %347 = vmatprep.subr.mxu0 %v302_v55  ;;  %474 = vmatprep.subr.mxu1 %v385_v16  ;;  %v427_v52 = vld [vmem:[#allocation7 + $0x168] sm:$0xff]  ;;  %v426_v53 = vld [vmem:[#allocation7 + $0x160] sm:$0xff]  ;;  %v425_v54 = vld [vmem:[#allocation7 + $0x158] sm:$0xff] }
  0x7d   : > { %348 = vmatpush2.msra.mxu0 %v301_v57  ;;  %475 = vmatpush1.msra.mxu1 %v384_v18  ;;  %v424_v55 = vld [vmem:[#allocation7 + $0x150] sm:$0xff]  ;;  %v423_v56 = vld [vmem:[#allocation7 + $0x148] sm:$0xff]  ;;  %v422_v57 = vld [vmem:[#allocation7 + $0x140] sm:$0xff] }
  0x7e   : > { %349 = vmatprep.subr.mxu0 %v300_v59  ;;  %476 = vmatprep.subr.mxu1 %v383_v20  ;;  %v421_v58 = vld [vmem:[#allocation7 + $0x138] sm:$0xff]  ;;  %v420_v59 = vld [vmem:[#allocation7 + $0x130] sm:$0xff]  ;;  %v419_v60 = vld [vmem:[#allocation7 + $0x128] sm:$0xff] }
  0x7f   : > { %350 = vmatpush2.msra.mxu0 %v299_v61  ;;  %477 = vmatpush1.msra.mxu1 %v382_v22  ;;  %v418_v61 = vld [vmem:[#allocation7 + $0x120] sm:$0xff]  ;;  %v417_v62 = vld [vmem:[#allocation7 + $0x118] sm:$0xff]  ;;  %v415_v0 = vld [vmem:[#allocation7 + $0x108] sm:$0xff] }
  0x80   : > { %351 = vmatprep.subr.mxu0 %v298_v63  ;;  %478 = vmatprep.subr.mxu1 %v445_v24  ;;  %v416_v63 = vld [vmem:[#allocation7 + $0x110] sm:$0xff] }
  0x81   : > { %352 = vmatpush2.msra.mxu0 %v297_v1  ;;  %479 = vmatpush2.msra.mxu1 %v444_v26  ;;  %v414_v1 = vld [vmem:[#allocation7 + $0x100] sm:$0xff] }
  0x82   : > { %353 = vmatprep.subr.mxu0 %v296_v3  ;;  %480 = vmatprep.subr.mxu1 %v443_v28 }
  0x83   : > { %354 = vmatpush2.msra.mxu0 %v295_v5  ;;  %481 = vmatpush2.msra.mxu1 %v442_v30 }
  0x84   : > { %355 = vmatprep.subr.mxu0 %v294_v7  ;;  %482 = vmatprep.subr.mxu1 %v441_v32 }
  0x85   : > { %356 = vmatpush2.msra.mxu0 %v293_v9  ;;  %483 = vmatpush2.msra.mxu1 %v440_v34 }
  0x86   : > { %357 = vmatprep.subr.mxu0 %v292_v11  ;;  %484 = vmatprep.subr.mxu1 %v439_v36  ;;  %v526_v11 = vshrl.u32 %v525_v10, 7 }
  0x87   : > { %358 = vmatpush2.msra.mxu0 %v291_v13  ;;  %485 = vmatpush2.msra.mxu1 %v438_v38  ;;  %v521_v13 = vld [vmem:[%s1113_s3] ss:$2 sm:$0x3] }
  0x88   : > { %359 = vmatprep.subr.mxu0 %v290_v15  ;;  %486 = vmatprep.subr.mxu1 %v437_v40  ;;  %v527_v12 = vsub.s32 0, %v526_v11  ;;  %v531_v14 = vsub.s32 1, %v526_v11  ;;  %v669_v15 = vld [vmem:[%s1113_s3 + $0x1] ss:$2 sm:$0x3] }
  0x89   : > { %360 = vmatpush2.msra.mxu0 %v289_v17  ;;  %487 = vmatpush2.msra.mxu1 %v436_v42 }
  0x8a   : > { %361 = vmatprep.subr.mxu0 %v288_v19  ;;  %488 = vmatprep.subr.mxu1 %v435_v44  ;;  %v528_v16 = vrot.slane %v521_v13, %v527_v12  ;;  %v532_v19 = vrot.slane %v521_v13, %v531_v14  ;;  %v541_v20 = vrot.slane %v669_v15, %v527_v12 }
  0x8b   : > { %362 = vmatpush2.msra.mxu0 %v287_v21  ;;  %489 = vmatpush2.msra.mxu1 %v434_v45  ;;  %v545_v24 = vrot.slane %v669_v15, %v531_v14 }
  0x8c   : > { %363 = vmatprep.subr.mxu0 %v286_v23  ;;  %490 = vmatprep.subr.mxu1 %v433_v46 }
  0x8d   : > { %364 = vmatpush2.msra.mxu0 %v285_v25  ;;  %491 = vmatpush2.msra.mxu1 %v432_v47 }
  0x8e   : > { %365 = vmatprep.subr.mxu0 %v284_v27  ;;  %492 = vmatprep.subr.mxu1 %v431_v48 }
  0x8f   : > { %366 = vmatpush2.msra.mxu0 %v283_v29  ;;  %493 = vmatpush2.msra.mxu1 %v430_v49 }
  0x90   : > { %367 = vmatprep.subr.mxu0 %v282_v31  ;;  %494 = vmatprep.subr.mxu1 %v429_v50 }
  0x91   : > { %368 = vmatpush2.msra.mxu0 %v281_v33  ;;  %495 = vmatpush2.msra.mxu1 %v428_v51 }
  0x92   : > { %369 = vmatprep.subr.mxu0 %v280_v35  ;;  %496 = vmatprep.subr.mxu1 %v427_v52 }
  0x93   : > { %370 = vmatpush2.msra.mxu0 %v279_v37  ;;  %497 = vmatpush2.msra.mxu1 %v426_v53 }
  0x94   : > { %371 = vmatprep.subr.mxu0 %v278_v39  ;;  %498 = vmatprep.subr.mxu1 %v425_v54 }
  0x95   : > { %372 = vmatpush2.msra.mxu0 %v277_v41  ;;  %499 = vmatpush2.msra.mxu1 %v424_v55 }
  0x96   : > { %374 = vmatmul.mubr.f32.vlgmr.msra.gmra.mxu0 %v243_v43  ;;  %500 = vmatprep.subr.mxu1 %v423_v56 }
  0x97   : > { %501 = vmatpush2.msra.mxu1 %v422_v57 }
  0x98   : > { %502 = vmatprep.subr.mxu1 %v421_v58 }
  0x99   : > { %503 = vmatpush2.msra.mxu1 %v420_v59 }
  0x9a   : > { %504 = vmatprep.subr.mxu1 %v419_v60 }
  0x9b   : > { %505 = vmatpush2.msra.mxu1 %v418_v61 }
  0x9c   : > { %506 = vmatprep.subr.mxu1 %v417_v62 }
  0x9d   : > { %507 = vmatpush2.msra.mxu1 %v416_v63 }
  0x9e   : > { %508 = vmatprep.subr.mxu1 %v415_v0 }
  0x9f   : > { %509 = vmatpush2.msra.mxu1 %v414_v1 }
 0x156   : > { %v375_v2 = vpop.f32.mrf.mxu0 }
 0x157   : > { %v380_v5 = vmul.f32 %v375_v2, %v375_v2 }
 0x158   : > { %v377_v3 = vpop.f32.mrf.mxu0 }
 0x159   : > { %v381_v4 = vmul.f32 %v377_v3, %v377_v3 }
 0x15b   : > { %510 = vmatprep.mubr.f32.mxu1 %v381_v4 }
 0x15c   : > { %511 = vmatmul.mubr.f32.vlgmr.msra.gmra.mxu1 %v380_v5 }
 0x21c   : > { %v512_v6 = vpop.f32.mrf.mxu1 }
 0x21d   : > { %v513_v7 = vadd.f32 1e-12, %v512_v6 }
 0x21e   : > { %v514_v8 = vpop.f32.mrf.mxu1 }
 0x21f   : > { %746 = vrsqrt.f32 %v513_v7  ;;  %v515_v9 = vadd.f32 1e-12, %v514_v8 }
 0x221   : > { %748 = vrsqrt.f32 %v515_v9 }
 0x22c   : > { %v747_v17 = vpop.eup %746 }
 0x22d   : > { %v519_v18 = vmul.f32 %v747_v17, %v375_v2 }
 0x22e   : > { %v749_v21 = vpop.eup %748 }
 0x22f   : > { %v520_v22 = vmul.f32 %v749_v21, %v377_v3  ;;  %v535_v23 = vmul.f32 %v528_v16, %v519_v18 }
 0x231   : > { %v536_v25 = vmul.f32 %v532_v19, %v520_v22  ;;  %v548_v26 = vadd.f32 %v541_v20, %v535_v23 }
 0x233   : > { %v549_v27 = vadd.f32 %v545_v24, %v536_v25  ;;  %550 = vst [vmem:[%s242_s7] sm:$0xff] %v548_v26 }
 0x235   : > { %551 = vst [vmem:[%s242_s7 + $0x8] sm:$0xff] %v549_v27 }
 0x236   : > { %843 = shalt.err (!%p840_p9)
}
 0x237   : > { %s844_s9 = scalar_lea.hbm %s565_s26, 256  ;;  %s848_s21 = scalar_lea.hbm %s1114_s4, 512 }
 0x238   : > { %p845_p13 = scmp.ne.s32.totalorder %s565_s26, %s844_s9  ;;  %p849_p4 = scmp.lt.s32.totalorder %s565_s26, %s1114_s4 }
 0x239   : > { %p850_p8 = scmp.lt.s32.totalorder %s848_s21, %s844_s9 }
 0x23a   : > { %p846_p5 = pnand %p845_p13, %p1130_p0 }
 0x23b   : > { %p851_p3 = por %p850_p8, %p849_p4 }
 0x23c   : > { %p847_p10 = pneg %p846_p5 }
 0x23e   : > { %p852_p11 = pnand %p851_p3, %p847_p10 }
 0x240   : > { %855 = shalt.err (!%p852_p11)
}
 0x241   : > { %687 = dma.vmem_to_hbm [thread:$0]  (%p1130_p0), %s568_s12, 256, %s565_s26, %s553_s24  }
 0x242 PF: > { %s579_s5 = sand.u32 1, %s886_s15   ;;  %p1131_p1 = scmp.ne.s32.totalorder %s1120_s22, 0 }
 0x243   : > { %p1132_p2 = scmp.ge.s32.totalorder %s898_s18, 2  ;;  %s580_s6 = scalar_lea.sflag [#allocation4], %s579_s5 }
 0x245   : > { %p701_p6 = pnand %p1132_p2, %p1131_p1 }
 0x247   : > { %p702_p12 = pneg %p701_p6 }
 0x249   : > { %881 = dma.done.wait (%p702_p12), %s580_s6, 256  }
 0x24a   : > { %883 = vsyncadd (%p702_p12), %s580_s6, 4294967040  ;;  %p18_p7 = scmp.ge.s32.totalorder %s1003_s11, 4   ;;  %s1133_s15 = smov %s890_s16 }
 0x24b   : > { %s1134_s16 = smov %s894_s17  ;;  %s1135_s17 = smov %s1019_s20 }
 0x24c   : > { %s1136_s18 = smov %s1003_s11  ;;  %20 = sbr.rel (!%p18_p7) target bundleno = 6 (0x6), region = 90 }
 0x251   :  { %585 = vsyncpa [#allocation3], 1 }
 0x252   :  { %587 = vsyncpa [#allocation3 + $0x1], 1 }
 0x253   :  { %588 = vsyncpa [#allocation6], 1 }
 0x254   :  { %589 = vsyncpa [#allocation4], 1 }
 0x255   :  { %591 = vsyncpa [#allocation4 + $0x1], 1 }

</bundles_post_ra>
